<compile_context>
chip_gen: v7x
topology: tpu7x:2x2x1
jax: 0.10.0
libtpu: 0.0.40
codegen_flags: <defaults>
</compile_context>

<pallas_src>
import functools

import jax
import jax.numpy as jnp
import numpy as np
from jax import lax
from jax.experimental import pallas as pl
from jax.experimental.pallas import tpu as pltpu


def _gnn_kernel(x_ref, w_ref, b_ref, g_ref, bt_ref, o_ref,
                pre_scr, sum_scr, sq_scr, *, neighbor_num, batch):
    p = pl.program_id(0)          # pass: 0 = compute + accumulate stats, 1 = normalize + store
    j = pl.program_id(1)          # batch-tile index
    tb, n, c = x_ref.shape
    kf = float(neighbor_num)

    @pl.when(p == 0)
    def _compute_pass():
        @pl.when(j == 0)
        def _init():
            sum_scr[...] = jnp.zeros_like(sum_scr)
            sq_scr[...] = jnp.zeros_like(sq_scr)

        x = x_ref[...]                                          # (tb, n, c) f32

        # ---- fused U|V projection: one MXU matmul against [U; V] (2c, c) in PyTorch
        # (out, in) layout; contract on the weight's `in` dimension (no transposes).
        x2d = x.reshape(tb * n, c)
        uv = lax.dot_general(x2d, w_ref[...], (((1,), (1,)), ((), ())),
                             preferred_element_type=jnp.float32) + b_ref[...]
        ux = uv[:, :c].reshape(tb, n, c)
        vx = uv[:, c:].reshape(tb, n, c)

        # ---- similarity: si[b] = x[b] @ x[b]^T (batched MXU matmul), kept in f32.
        si = jnp.einsum('bic,bjc->bij', x, x,
                        preferred_element_type=jnp.float32)     # (tb, n, n)

        # ---- adjacency by strict rank count (== torch.topk k-th-value semantics,
        # duplicates included):  adj[r, j] = 1  iff  #{m : si[r, m] > si[r, j]} < k.
        if tb * n * n * n <= (1 << 20):
            gt = (si[:, :, :, None] > si[:, :, None, :]).astype(jnp.float32)
            cnt = jnp.sum(gt, axis=2)                           # reduce over m (sublane axis)
        else:
            cnt = jnp.zeros_like(si)                            # bounded-VMEM fallback
            for m in range(n):                                  # static loop, compare + add
                cnt = cnt + (si[..., m:m + 1] > si).astype(jnp.float32)
        adj = (cnt < kf).astype(jnp.float32)                    # (tb, n, n)

        # ---- normalize_digraph folded into the aggregation:
        #   A @ V(x) == dinv * (adj @ (dinv * V(x))),  dinv = deg^{-1/2},  deg >= 1.
        deg = jnp.sum(adj, axis=-1, keepdims=True)              # (tb, n, 1)
        dinv = lax.rsqrt(deg)
        agg = dinv * jnp.einsum('bij,bjc->bic', adj, dinv * vx,
                                preferred_element_type=jnp.float32)
        pre = agg + ux                                          # pre-BN activations

        pre_scr[pl.ds(j * tb, tb), :, :] = pre
        sum_scr[...] += jnp.sum(pre, axis=0)                    # (n, c)  Σ  over batch tile
        sq_scr[...] += jnp.sum(pre * pre, axis=0)               # (n, c)  Σ of squares

    @pl.when(p == 1)
    def _normalize_pass():
        # BatchNorm1d(num_classes), training mode: per-node stats over (batch, channel),
        # one-pass biased variance (E[x²] − mean²), eps = 1e-5; affine folded into
        # scale/shift.  The (n, c) -> (n, 1) channel reduction of the accumulators is tiny.
        denom = float(batch * c)
        s = jnp.sum(sum_scr[...], axis=1, keepdims=True)        # (n, 1)
        sq = jnp.sum(sq_scr[...], axis=1, keepdims=True)        # (n, 1)
        mean = s / denom
        var = sq / denom - mean * mean
        inv_std = lax.rsqrt(var + 1e-5)
        scale = (g_ref[...] * inv_std).reshape(1, n, 1)
        shift = (bt_ref[...] - mean * g_ref[...] * inv_std).reshape(1, n, 1)

        pre = pre_scr[pl.ds(j * tb, tb), :, :]
        o_ref[...] = jnp.maximum(x_ref[...] + pre * scale + shift, 0.0)


def _largest_divisor_leq(n, cap):
    for t in range(min(cap, n), 0, -1):
        if n % t == 0:
            return t
    return 1


def gnn_forward(x, uw, ub, vw, vb, gamma, beta, *, neighbor_num=4, batch_tile=None):
    b, n, c = x.shape
    assert 1 <= neighbor_num <= n, "neighbor_num must be in [1, num_classes]"

    tb = batch_tile if batch_tile is not None else _largest_divisor_leq(b, 8)
    assert b % tb == 0
    num_tiles = b // tb

    x = x.astype(jnp.float32)
    # PyTorch-layout (out, in) weights stacked once: [U; V] -> (2c, c); biases -> (1, 2c).
    w_cat = jnp.concatenate([uw, vw], axis=0).astype(jnp.float32)
    b_cat = jnp.concatenate([ub, vb], axis=0).reshape(1, 2 * c).astype(jnp.float32)
    gamma2 = gamma.reshape(n, 1).astype(jnp.float32)
    beta2 = beta.reshape(n, 1).astype(jnp.float32)

    kernel = functools.partial(_gnn_kernel, neighbor_num=neighbor_num, batch=b)

    def const_spec(shape):
        nd = len(shape)
        return pl.BlockSpec(shape, lambda p, j, _nd=nd: (0,) * _nd)

    in_specs = [
        pl.BlockSpec((tb, n, c), lambda p, j: (j, 0, 0)),       # x, batch-tiled
        const_spec((2 * c, c)),                                 # [U; V] weights (resident)
        const_spec((1, 2 * c)),                                 # [ub | vb]
        const_spec((n, 1)),                                     # bnv gamma
        const_spec((n, 1)),                                     # bnv beta
    ]
    # Output block stays pinned at 0 during pass 0 (no garbage writebacks); during pass 1
    # it tracks the batch tile, so each block is flushed exactly once with final data.
    out_specs = pl.BlockSpec((tb, n, c), lambda p, j: (j * p, 0, 0))

    scratch_shapes = [
        pltpu.VMEM((b, n, c), jnp.float32),   # pre-BN activations, full batch
        pltpu.VMEM((n, c), jnp.float32),      # Σ pre   (per node, per channel)
        pltpu.VMEM((n, c), jnp.float32),      # Σ pre²
    ]

    flops = 4 * b * n * c * c + 4 * b * n * n * c + 2 * b * n ** 3 + 12 * b * n * c
    bytes_accessed = 4 * (3 * b * n * c + 2 * c * c + 2 * c + 2 * n)
    cost = pl.CostEstimate(flops=flops, transcendentals=b * n + n,
                           bytes_accessed=bytes_accessed)

    # Scoped-VMEM budget: full-size pre scratch + stat accumulators + double-buffered
    # x/out tiles + resident weights + headroom for in-kernel temporaries (si, rank count).
    vmem_bytes = 4 * (b * n * c + 2 * n * c + 4 * tb * n * c + 2 * c * c + 2 * c
                      + 8 * tb * n * c + 4 * tb * n * n + tb * n ** 3)
    vmem_limit = int(min(64 * 2 ** 20, max(16 * 2 ** 20, 2 * vmem_bytes)))

    return pl.pallas_call(
        kernel,
        out_shape=jax.ShapeDtypeStruct((b, n, c), jnp.float32),
        grid=(2, num_tiles),
        in_specs=in_specs,
        out_specs=out_specs,
        scratch_shapes=scratch_shapes,
        compiler_params=pltpu.CompilerParams(
            dimension_semantics=("arbitrary", "arbitrary"),
            vmem_limit_bytes=vmem_limit),
        cost_estimate=cost,
    )(x, w_cat, b_cat, gamma2, beta2)


def _gnn_reference(x, uw, ub, vw, vb, gamma, beta, neighbor_num):
    """Pure-JAX reference mirroring the PyTorch forward (metric='dots', training mode)."""
    b, n, c = x.shape
    si = jnp.einsum('bic,bjc->bij', x, x)
    thr = jnp.sort(si, axis=-1)[..., -neighbor_num][..., None]
    adj = (si >= thr).astype(jnp.float32)
    deg = adj.sum(-1)
    dinv = deg ** -0.5
    A = dinv[:, :, None] * adj * dinv[:, None, :]
    vx = x @ vw.T + vb
    ux = x @ uw.T + ub
    pre = jnp.einsum('bij,bjc->bic', A, vx) + ux
    mean = pre.mean(axis=(0, 2), keepdims=True)
    var = ((pre - mean) ** 2).mean(axis=(0, 2), keepdims=True)
    bn = (pre - mean) / jnp.sqrt(var + 1e-5) * gamma[None, :, None] + beta[None, :, None]
    return jnp.maximum(x + bn, 0.0)


if __name__ == "__main__":
    # Small, forward-consistent shapes: batch=2, num_classes (nodes)=8, in_channels=32.
    b, n, c = 2, 8, 32
    neighbor_num = 4

    key = jax.random.PRNGKey(0)
    kx, ku, kub, kv, kvb = jax.random.split(key, 5)

    x = jax.random.normal(kx, (b, n, c), jnp.float32)

    # Deterministic parameter init mirroring GNN.__init__:
    #   U/V weights ~ N(0, sqrt(2/in_channels)); Linear biases ~ U(-1/sqrt(c), 1/sqrt(c));
    #   bnv weight = 1, bnv bias = 0.
    std = (2.0 / c) ** 0.5
    uw = std * jax.random.normal(ku, (c, c), jnp.float32)   # PyTorch (out, in) layout
    vw = std * jax.random.normal(kv, (c, c), jnp.float32)
    bound = 1.0 / (c ** 0.5)
    ub = jax.random.uniform(kub, (c,), jnp.float32, -bound, bound)
    vb = jax.random.uniform(kvb, (c,), jnp.float32, -bound, bound)
    gamma = jnp.ones((n,), jnp.float32)
    beta = jnp.zeros((n,), jnp.float32)

    out = gnn_forward(x, uw, ub, vw, vb, gamma, beta, neighbor_num=neighbor_num)
    jax.block_until_ready(out)
    assert out.shape == (b, n, c) and out.dtype == jnp.float32

    ref = _gnn_reference(x, uw, ub, vw, vb, gamma, beta, neighbor_num)
    np.testing.assert_allclose(np.asarray(out), np.asarray(ref), rtol=1e-3, atol=1e-3)

    print("KERNEL_OK")
</pallas_src>

<mosaic_0001>
module attributes {stable_mosaic.version = 11 : i64} {
  func.func @_gnn_kernel(%arg0: i32, %arg1: i32, %arg2: memref<2x8x32xf32, #tpu.memory_space<vmem>>, %arg3: memref<64x32xf32, #tpu.memory_space<vmem>>, %arg4: memref<1x64xf32, #tpu.memory_space<vmem>>, %arg5: memref<8x1xf32, #tpu.memory_space<vmem>>, %arg6: memref<8x1xf32, #tpu.memory_space<vmem>>, %arg7: memref<2x8x32xf32, #tpu.memory_space<vmem>>, %arg8: memref<2x8x32xf32, #tpu.memory_space<vmem>>, %arg9: memref<8x32xf32, #tpu.memory_space<vmem>>, %arg10: memref<8x32xf32, #tpu.memory_space<vmem>>) attributes {dimension_semantics = [#tpu.dimension_semantics<arbitrary>, #tpu.dimension_semantics<arbitrary>], iteration_bounds = array<i64: 2, 1>, scalar_prefetch = 0 : i64, scratch_operands = 3 : i64, tpu.core_type = #tpu.core_type<tc>, window_params = [{transform_indices = @transform_0, window_bounds = array<i64: 2, 8, 32>}, {pipeline_mode = #tpu.pipeline_mode<synchronous>, transform_indices = @transform_1, window_bounds = array<i64: 64, 32>}, {pipeline_mode = #tpu.pipeline_mode<synchronous>, transform_indices = @transform_2, window_bounds = array<i64: 1, 64>}, {pipeline_mode = #tpu.pipeline_mode<synchronous>, transform_indices = @transform_3, window_bounds = array<i64: 8, 1>}, {pipeline_mode = #tpu.pipeline_mode<synchronous>, transform_indices = @transform_4, window_bounds = array<i64: 8, 1>}, {transform_indices = @transform_5, window_bounds = array<i64: 2, 8, 32>}]} {
    %c0_i32 = arith.constant 0 : i32
    %0 = arith.cmpi eq, %arg0, %c0_i32 : i32
    %1 = arith.extui %0 : i1 to i32
    %c0_i32_0 = arith.constant 0 : i32
    %2 = arith.cmpi ne, %1, %c0_i32_0 : i32
    scf.if %2 {
      %c0_i32_2 = arith.constant 0 : i32
      %6 = arith.cmpi eq, %arg1, %c0_i32_2 : i32
      %7 = arith.extui %6 : i1 to i32
      %c0_i32_3 = arith.constant 0 : i32
      %8 = arith.cmpi ne, %7, %c0_i32_3 : i32
      scf.if %8 {
        %cst_27 = arith.constant 0.000000e+00 : f32
        %54 = vector.broadcast %cst_27 : f32 to vector<8x32xf32>
        %c0_28 = arith.constant 0 : index
        %c0_29 = arith.constant 0 : index
        %55 = vector.load %arg9[%c0_28, %c0_29] : memref<8x32xf32, #tpu.memory_space<vmem>>, vector<8x32xf32>
        tpu.vector_store %arg9[%c0_28, %c0_29], %54 {strides = array<i32>} : memref<8x32xf32, #tpu.memory_space<vmem>>, vector<8x32xf32>,
        %cst_30 = arith.constant 0.000000e+00 : f32
        %56 = vector.broadcast %cst_30 : f32 to vector<8x32xf32>
        %c0_31 = arith.constant 0 : index
        %c0_32 = arith.constant 0 : index
        %57 = vector.load %arg10[%c0_31, %c0_32] : memref<8x32xf32, #tpu.memory_space<vmem>>, vector<8x32xf32>
        tpu.vector_store %arg10[%c0_31, %c0_32], %56 {strides = array<i32>} : memref<8x32xf32, #tpu.memory_space<vmem>>, vector<8x32xf32>,
      } else {
      }
      %c0 = arith.constant 0 : index
      %c0_4 = arith.constant 0 : index
      %c0_5 = arith.constant 0 : index
      %9 = vector.load %arg2[%c0, %c0_4, %c0_5] : memref<2x8x32xf32, #tpu.memory_space<vmem>>, vector<2x8x32xf32>
      %10 = vector.shape_cast %9 : vector<2x8x32xf32> to vector<16x32xf32>
      %c0_6 = arith.constant 0 : index
      %c0_7 = arith.constant 0 : index
      %11 = vector.load %arg3[%c0_6, %c0_7] : memref<64x32xf32, #tpu.memory_space<vmem>>, vector<64x32xf32>
      %cst = arith.constant dense<0.000000e+00> : vector<16x64xf32>
      %12 = tpu.matmul %10, %11, %cst {dimension_numbers = #tpu.dot_dimension_numbers<[1], [1], [0], [0], [0, 0, 1, 0], [], []>} : vector<16x32xf32>, vector<64x32xf32>, vector<16x64xf32> -> vector<16x64xf32>
      %c0_8 = arith.constant 0 : index
      %c0_9 = arith.constant 0 : index
      %13 = vector.load %arg4[%c0_8, %c0_9] : memref<1x64xf32, #tpu.memory_space<vmem>>, vector<1x64xf32>
      %14 = vector.broadcast %13 : vector<1x64xf32> to vector<16x64xf32>
      %15 = arith.addf %12, %14 : vector<16x64xf32>
      %16 = vector.extract_strided_slice %15 {offsets = [0, 0], sizes = [16, 32], strides = [1, 1]} : vector<16x64xf32> to vector<16x32xf32>
      %17 = vector.shape_cast %16 : vector<16x32xf32> to vector<2x8x32xf32>
      %18 = vector.extract_strided_slice %15 {offsets = [0, 32], sizes = [16, 32], strides = [1, 1]} : vector<16x64xf32> to vector<16x32xf32>
      %19 = vector.shape_cast %18 : vector<16x32xf32> to vector<2x8x32xf32>
      "tpu.trace_start"() <{level = 10 : i32, message = "bic,bjc->bij"}> : () -> ()
      %cst_10 = arith.constant dense<0.000000e+00> : vector<2x8x8xf32>
      %20 = tpu.matmul %9, %9, %cst_10 {dimension_numbers = #tpu.dot_dimension_numbers<[2], [2], [1], [1], [0, 0, 0, 1, 1, 1], [0], [0]>} : vector<2x8x32xf32>, vector<2x8x32xf32>, vector<2x8x8xf32> -> vector<2x8x8xf32>
      "tpu.trace_stop"() : () -> ()
      %21 = vector.shape_cast %20 : vector<2x8x8xf32> to vector<2x8x8x1xf32>
      %22 = vector.shape_cast %20 : vector<2x8x8xf32> to vector<2x8x1x8xf32>
      %23 = vector.broadcast %21 : vector<2x8x8x1xf32> to vector<2x8x8x8xf32>
      %24 = vector.broadcast %22 : vector<2x8x1x8xf32> to vector<2x8x8x8xf32>
      %25 = arith.cmpf ogt, %23, %24 : vector<2x8x8x8xf32>
      %26 = arith.extui %25 : vector<2x8x8x8xi1> to vector<2x8x8x8xi32>
      %27 = arith.sitofp %26 : vector<2x8x8x8xi32> to vector<2x8x8x8xf32>
      %cst_11 = arith.constant dense<0.000000e+00> : vector<2x8x8xf32>
      %28 = vector.multi_reduction <add>, %27, %cst_11 [2] : vector<2x8x8x8xf32> to vector<2x8x8xf32>
      %cst_12 = arith.constant 4.000000e+00 : f32
      %29 = vector.broadcast %cst_12 : f32 to vector<2x8x8xf32>
      %30 = arith.cmpf olt, %28, %29 : vector<2x8x8xf32>
      %31 = arith.extui %30 : vector<2x8x8xi1> to vector<2x8x8xi32>
      %32 = arith.sitofp %31 : vector<2x8x8xi32> to vector<2x8x8xf32>
      %cst_13 = arith.constant dense<0.000000e+00> : vector<2x8xf32>
      %33 = vector.multi_reduction <add>, %32, %cst_13 [2] : vector<2x8x8xf32> to vector<2x8xf32>
      %34 = vector.shape_cast %33 : vector<2x8xf32> to vector<2x8x1xf32>
      %35 = math.rsqrt %34 : vector<2x8x1xf32>
      %36 = vector.broadcast %35 : vector<2x8x1xf32> to vector<2x8x32xf32>
      %37 = arith.mulf %36, %19 : vector<2x8x32xf32>
      "tpu.trace_start"() <{level = 10 : i32, message = "bij,bjc->bic"}> : () -> ()
      %cst_14 = arith.constant dense<0.000000e+00> : vector<2x8x32xf32>
      %38 = tpu.matmul %32, %37, %cst_14 {dimension_numbers = #tpu.dot_dimension_numbers<[2], [1], [1], [2], [0, 0, 0, 1, 1, 2], [0], [0]>} : vector<2x8x8xf32>, vector<2x8x32xf32>, vector<2x8x32xf32> -> vector<2x8x32xf32>
      "tpu.trace_stop"() : () -> ()
      %39 = vector.broadcast %35 : vector<2x8x1xf32> to vector<2x8x32xf32>
      %40 = arith.mulf %39, %38 : vector<2x8x32xf32>
      %41 = arith.addf %40, %17 : vector<2x8x32xf32>
      %c2_i32 = arith.constant 2 : i32
      %42 = arith.muli %arg1, %c2_i32 : i32
      %43 = arith.index_cast %42 : i32 to index
      %c0_15 = arith.constant 0 : index
      %c0_16 = arith.constant 0 : index
      %44 = vector.load %arg8[%43, %c0_15, %c0_16] : memref<2x8x32xf32, #tpu.memory_space<vmem>>, vector<2x8x32xf32>
      tpu.vector_store %arg8[%43, %c0_15, %c0_16], %41 {strides = array<i32>} : memref<2x8x32xf32, #tpu.memory_space<vmem>>, vector<2x8x32xf32>,
      %c0_17 = arith.constant 0 : index
      %c0_18 = arith.constant 0 : index
      %45 = vector.load %arg9[%c0_17, %c0_18] : memref<8x32xf32, #tpu.memory_space<vmem>>, vector<8x32xf32>
      %cst_19 = arith.constant dense<0.000000e+00> : vector<8x32xf32>
      %46 = vector.multi_reduction <add>, %41, %cst_19 [0] : vector<2x8x32xf32> to vector<8x32xf32>
      %47 = arith.addf %45, %46 : vector<8x32xf32>
      %c0_20 = arith.constant 0 : index
      %c0_21 = arith.constant 0 : index
      %48 = vector.load %arg9[%c0_20, %c0_21] : memref<8x32xf32, #tpu.memory_space<vmem>>, vector<8x32xf32>
      tpu.vector_store %arg9[%c0_20, %c0_21], %47 {strides = array<i32>} : memref<8x32xf32, #tpu.memory_space<vmem>>, vector<8x32xf32>,
      %c0_22 = arith.constant 0 : index
      %c0_23 = arith.constant 0 : index
      %49 = vector.load %arg10[%c0_22, %c0_23] : memref<8x32xf32, #tpu.memory_space<vmem>>, vector<8x32xf32>
      %50 = arith.mulf %41, %41 : vector<2x8x32xf32>
      %cst_24 = arith.constant dense<0.000000e+00> : vector<8x32xf32>
      %51 = vector.multi_reduction <add>, %50, %cst_24 [0] : vector<2x8x32xf32> to vector<8x32xf32>
      %52 = arith.addf %49, %51 : vector<8x32xf32>
      %c0_25 = arith.constant 0 : index
      %c0_26 = arith.constant 0 : index
      %53 = vector.load %arg10[%c0_25, %c0_26] : memref<8x32xf32, #tpu.memory_space<vmem>>, vector<8x32xf32>
      tpu.vector_store %arg10[%c0_25, %c0_26], %52 {strides = array<i32>} : memref<8x32xf32, #tpu.memory_space<vmem>>, vector<8x32xf32>,
    } else {
    }
    %c1_i32 = arith.constant 1 : i32
    %3 = arith.cmpi eq, %arg0, %c1_i32 : i32
    %4 = arith.extui %3 : i1 to i32
    %c0_i32_1 = arith.constant 0 : i32
    %5 = arith.cmpi ne, %4, %c0_i32_1 : i32
    scf.if %5 {
      %c0 = arith.constant 0 : index
      %c0_2 = arith.constant 0 : index
      %6 = vector.load %arg9[%c0, %c0_2] : memref<8x32xf32, #tpu.memory_space<vmem>>, vector<8x32xf32>
      %cst = arith.constant dense<0.000000e+00> : vector<8xf32>
      %7 = vector.multi_reduction <add>, %6, %cst [1] : vector<8x32xf32> to vector<8xf32>
      %8 = vector.shape_cast %7 : vector<8xf32> to vector<8x1xf32>
      %c0_3 = arith.constant 0 : index
      %c0_4 = arith.constant 0 : index
      %9 = vector.load %arg10[%c0_3, %c0_4] : memref<8x32xf32, #tpu.memory_space<vmem>>, vector<8x32xf32>
      %cst_5 = arith.constant dense<0.000000e+00> : vector<8xf32>
      %10 = vector.multi_reduction <add>, %9, %cst_5 [1] : vector<8x32xf32> to vector<8xf32>
      %11 = vector.shape_cast %10 : vector<8xf32> to vector<8x1xf32>
      %cst_6 = arith.constant 6.400000e+01 : f32
      %12 = vector.broadcast %cst_6 : f32 to vector<8x1xf32>
      %13 = arith.divf %8, %12 : vector<8x1xf32>
      %cst_7 = arith.constant 6.400000e+01 : f32
      %14 = vector.broadcast %cst_7 : f32 to vector<8x1xf32>
      %15 = arith.divf %11, %14 : vector<8x1xf32>
      %16 = arith.mulf %13, %13 : vector<8x1xf32>
      %17 = arith.subf %15, %16 : vector<8x1xf32>
      %cst_8 = arith.constant 9.99999974E-6 : f32
      %18 = vector.broadcast %cst_8 : f32 to vector<8x1xf32>
      %19 = arith.addf %17, %18 : vector<8x1xf32>
      %20 = math.rsqrt %19 : vector<8x1xf32>
      %c0_9 = arith.constant 0 : index
      %c0_10 = arith.constant 0 : index
      %21 = vector.load %arg5[%c0_9, %c0_10] : memref<8x1xf32, #tpu.memory_space<vmem>>, vector<8x1xf32>
      %22 = arith.mulf %21, %20 : vector<8x1xf32>
      %23 = vector.shape_cast %22 : vector<8x1xf32> to vector<1x8x1xf32>
      %c0_11 = arith.constant 0 : index
      %c0_12 = arith.constant 0 : index
      %24 = vector.load %arg6[%c0_11, %c0_12] : memref<8x1xf32, #tpu.memory_space<vmem>>, vector<8x1xf32>
      %c0_13 = arith.constant 0 : index
      %c0_14 = arith.constant 0 : index
      %25 = vector.load %arg5[%c0_13, %c0_14] : memref<8x1xf32, #tpu.memory_space<vmem>>, vector<8x1xf32>
      %26 = arith.mulf %13, %25 : vector<8x1xf32>
      %27 = arith.mulf %26, %20 : vector<8x1xf32>
      %28 = arith.subf %24, %27 : vector<8x1xf32>
      %29 = vector.shape_cast %28 : vector<8x1xf32> to vector<1x8x1xf32>
      %c2_i32 = arith.constant 2 : i32
      %30 = arith.muli %arg1, %c2_i32 : i32
      %31 = arith.index_cast %30 : i32 to index
      %c0_15 = arith.constant 0 : index
      %c0_16 = arith.constant 0 : index
      %32 = vector.load %arg8[%31, %c0_15, %c0_16] : memref<2x8x32xf32, #tpu.memory_space<vmem>>, vector<2x8x32xf32>
      %c0_17 = arith.constant 0 : index
      %c0_18 = arith.constant 0 : index
      %c0_19 = arith.constant 0 : index
      %33 = vector.load %arg2[%c0_17, %c0_18, %c0_19] : memref<2x8x32xf32, #tpu.memory_space<vmem>>, vector<2x8x32xf32>
      %34 = vector.broadcast %23 : vector<1x8x1xf32> to vector<2x8x32xf32>
      %35 = arith.mulf %32, %34 : vector<2x8x32xf32>
      %36 = arith.addf %33, %35 : vector<2x8x32xf32>
      %37 = vector.broadcast %29 : vector<1x8x1xf32> to vector<2x8x32xf32>
      %38 = arith.addf %36, %37 : vector<2x8x32xf32>
      %cst_20 = arith.constant 0.000000e+00 : f32
      %39 = vector.broadcast %cst_20 : f32 to vector<2x8x32xf32>
      %40 = arith.maximumf %38, %39 : vector<2x8x32xf32>
      %c0_21 = arith.constant 0 : index
      %c0_22 = arith.constant 0 : index
      %c0_23 = arith.constant 0 : index
      %41 = vector.load %arg7[%c0_21, %c0_22, %c0_23] : memref<2x8x32xf32, #tpu.memory_space<vmem>>, vector<2x8x32xf32>
      tpu.vector_store %arg7[%c0_21, %c0_22, %c0_23], %40 {strides = array<i32>} : memref<2x8x32xf32, #tpu.memory_space<vmem>>, vector<2x8x32xf32>,
    } else {
    }
    return
  }
  func.func @transform_0(%arg0: i32, %arg1: i32) -> (i32, i32, i32) {
    %c0_i32 = arith.constant 0 : i32
    %c0_i32_0 = arith.constant 0 : i32
    %c0_i32_1 = arith.constant 0 : i32
    return %arg1, %c0_i32, %c0_i32_0 : i32, i32, i32
  }
  func.func @transform_1(%arg0: i32, %arg1: i32) -> (i32, i32) {
    %c0_i32 = arith.constant 0 : i32
    %c0_i32_0 = arith.constant 0 : i32
    %c0_i32_1 = arith.constant 0 : i32
    return %c0_i32, %c0_i32_0 : i32, i32
  }
  func.func @transform_2(%arg0: i32, %arg1: i32) -> (i32, i32) {
    %c0_i32 = arith.constant 0 : i32
    %c0_i32_0 = arith.constant 0 : i32
    %c0_i32_1 = arith.constant 0 : i32
    return %c0_i32, %c0_i32_0 : i32, i32
  }
  func.func @transform_3(%arg0: i32, %arg1: i32) -> (i32, i32) {
    %c0_i32 = arith.constant 0 : i32
    %c0_i32_0 = arith.constant 0 : i32
    %c0_i32_1 = arith.constant 0 : i32
    return %c0_i32, %c0_i32_0 : i32, i32
  }
  func.func @transform_4(%arg0: i32, %arg1: i32) -> (i32, i32) {
    %c0_i32 = arith.constant 0 : i32
    %c0_i32_0 = arith.constant 0 : i32
    %c0_i32_1 = arith.constant 0 : i32
    return %c0_i32, %c0_i32_0 : i32, i32
  }
  func.func @transform_5(%arg0: i32, %arg1: i32) -> (i32, i32, i32) {
    %0 = arith.muli %arg1, %arg0 : i32
    %c0_i32 = arith.constant 0 : i32
    %c0_i32_0 = arith.constant 0 : i32
    %c0_i32_1 = arith.constant 0 : i32
    return %0, %c0_i32, %c0_i32_0 : i32, i32, i32
  }
}

</mosaic_0001>

<bundles_post_ra>
// kernel: tpu_custom_call.1
= control target key start
LH: loop header
LB: loop body
LE: loop exit
PB: predicated region body
PF: predicated region fallthrough
CT: control target
= control target key end

     0   :  { %10 = vsyncpa [#allocation6], 0  ;;  %s2069_s0 = inlined_call_operand.vmem [shape: f32[2,8,32], index: 0, kind: input, shape index: {}]   ;;  %s2070_s1 = inlined_call_operand.vmem [shape: f32[64,32], index: 1, kind: input, shape index: {}]   ;;  %s2071_s2 = inlined_call_operand.vmem [shape: f32[1,64], index: 2, kind: input, shape index: {}]   ;;  %s2072_s3 = inlined_call_operand.vmem [shape: f32[8,1], index: 3, kind: input, shape index: {}]   ;;  %s2073_s4 = inlined_call_operand.vmem [shape: f32[8,1], index: 4, kind: input, shape index: {}]   ;;  %s2074_s5 = inlined_call_operand.hbm [shape: f32[2,8,32], index: 5, kind: output, shape index: {}]  }
   0x1   :  { %12 = vsyncpa [#allocation6 + $0x1], 0  ;;  %s1669_s18 = smov 0   ;;  %s1671_s19 = smov 0  }
   0x2   :  { %s1673_s20 = smov 0  }
   0x3 LB: > { %s1385_s21 = sadd.s32 4294967295, %s1629_s20   ;;  %s1386_s22 = sadd.s32 4294967294, %s1629_s20   ;;  %s1629_s20 = sphi %s1673_s20, %s18_s20   ;;  %s1625_s19 = sphi %s1671_s19, %s2079_s19   ;;  %s1621_s18 = sphi %s1669_s18, %s2078_s18  }
   0x4   : > { %s30_s23 = sadd.s32 1, %s1625_s19  ;;  %p1389_p0 = scmp.ge.s32.totalorder %s1629_s20, 1 }
   0x5   : > { %p32_p1 = scmp.ge.s32.totalorder %s30_s23, 2  ;;  %p205_p2 = scmp.lt.s32.totalorder %s1629_s20, 3 }
   0x7   : > { %s2081_s23 = smov (%p32_p1, %s30_s23), 0  ;;  %p206_p3 = pnand %p1389_p0, %p205_p2 }
   0x8   : > { %p1390_p4 = scmp.ne.s32.totalorder (!%p206_p3), %s1621_s18, 0 }
   0x9   : > { %209 = sbr.rel (%p206_p3) target bundleno = 1235 (0x4d3), region = 40 }
  0x10   : > { %244 = sbr.rel (%p1390_p4) target bundleno = 903 (0x387), region = 44  ;;  %vm249_vm0 = vcmask (!%p1390_p4), 261120   ;;  %v252_v0 = vld [vmem:[%s2069_s0] sm:$0xff] (!%p1390_p4)  ;;  %v1631_v1 = vmov (!%p1390_p4), 0.0   ;;  %vm1632_vm1 = vmmov (!%p1390_p4), 0   ;;  %v253_v2 = vld [vmem:[%s2069_s0 + $0x8] sm:$0xff] (!%p1390_p4)  ;;  %v515_v16 = vlaneseq (!%p1390_p4) }
  0x11   : > { %1482 = vmatprep.subr.mxu1 (!%p1390_p4), %v1631_v1  ;;  %250 = vst.msk [vmem:[#allocation3] sm:$0xff] (!%p1390_p4), %vm249_vm0, %v1631_v1  ;;  %251 = vst.msk [vmem:[#allocation4] sm:$0xff] (!%p1390_p4), %vm249_vm0, %v1631_v1  ;;  %1484 = vmatprep.mubr.msk.f32.mxu1 (!%p1390_p4), %vm1632_vm1, %v1631_v1  ;;  %v254_v3 = vld [vmem:[%s2070_s1] sm:$0xff] (!%p1390_p4)  ;;  %v255_v4 = vld [vmem:[%s2070_s1 + $0x8] sm:$0xff] (!%p1390_p4)  ;;  %v1633_v17 = vmov (!%p1390_p4), 1966171168  }
  0x12   : > { %1483 = vmatpush3.xpose.msk.msra.mxu1 (!%p1390_p4), %vm249_vm0, %v252_v0  ;;  %1479 = vmatprep.mubr.msk.f32.mxu0 (!%p1390_p4), %vm249_vm0, %v252_v0  ;;  %vm1724_vm2 = vmpackc.low (!%p1390_p4), %vm249_vm0, %vm249_vm0  ;;  %v1502_v6 = vpack.c.bf16 (!%p1390_p4), %v255_v4, %v254_v3  ;;  %v256_v7 = vld [vmem:[%s2070_s1 + $0x10] sm:$0xff] (!%p1390_p4)  ;;  %v257_v8 = vld [vmem:[%s2070_s1 + $0x18] sm:$0xff] (!%p1390_p4)  ;;  %v631_v18 = vunpack.c.l.s4 (!%p1390_p4), %v1633_v17  ;;  %v1763_v19 = vshrl.u32 (!%p1390_p4), %v515_v16, 7  ;;  %vm855_vm3 = vcmask (!%p1390_p4), 64512   ;;  %s1634_s27 = smov (!%p1390_p4), 96  }
  0x13   : > { %1487 = vmatprep.subr.mxu1 (!%p1390_p4), %v1631_v1  ;;  %v1508_v9 = vpack.c.bf16 (!%p1390_p4), %v257_v8, %v256_v7  ;;  %v258_v10 = vld [vmem:[%s2070_s1 + $0x20] sm:$0xff] (!%p1390_p4)  ;;  %v259_v11 = vld [vmem:[%s2070_s1 + $0x28] sm:$0xff] (!%p1390_p4)  ;;  %v260_v13 = vld [vmem:[%s2070_s1 + $0x30] sm:$0xff] (!%p1390_p4)  ;;  %vm1032_vm13 = vcmask (!%p1390_p4), 1041409  }
  0x14   : > { %1504 = vmatprep.subr.msk.bf16.mxu0 (!%p1390_p4), %vm1724_vm2, %v1502_v6  ;;  %v1514_v12 = vpack.c.bf16 (!%p1390_p4), %v259_v11, %v258_v10  ;;  %v261_v14 = vld [vmem:[%s2070_s1 + $0x38] sm:$0xff] (!%p1390_p4)  ;;  %v632_v20 = vunpack.c.0.s8 (!%p1390_p4), %v631_v18  ;;  %v1766_v21 = vsub.s32 (!%p1390_p4), 0, %v1763_v19  ;;  %v531_v22 = vsub.s32 (!%p1390_p4), 2, %v1763_v19 }
  0x15   : > { %1485 = vmatmul.mubr.msk.f32.vlgmr.msra.gmra.mrb[0].mxu1 (!%p1390_p4), %vm249_vm0, %v252_v0  ;;  %1507 = vmatpush3.bf16.xpose.msk.msra.mxu0 (!%p1390_p4), %vm1724_vm2, %v1502_v6  ;;  %v1520_v15 = vpack.c.bf16 (!%p1390_p4), %v261_v14, %v260_v13  ;;  %v538_v28 = vsub.s32 (!%p1390_p4), 3, %v1763_v19  ;;  %v524_v29 = vsub.s32 (!%p1390_p4), 1, %v1763_v19  ;;  %v552_v30 = vsub.s32 (!%p1390_p4), 5, %v1763_v19 }
  0x16   : > { %1488 = vmatpush3.xpose.msk.msra.mxu1 (!%p1390_p4), %vm249_vm0, %v253_v2  ;;  %1489 = vmatprep.mubr.msk.f32.mxu1 (!%p1390_p4), %vm1632_vm1, %v1631_v1  ;;  %v1770_v23 = vsub.s32 (!%p1390_p4), %v632_v20, %v1763_v19  ;;  %v545_v33 = vsub.s32 (!%p1390_p4), 4, %v1763_v19  ;;  %v559_v35 = vsub.s32 (!%p1390_p4), 6, %v1763_v19  ;;  %v566_v55 = vsub.s32 (!%p1390_p4), 7, %v1763_v19 }
  0x17   : > { %1492 = vmatprep.subr.mxu1 %v1631_v1  ;;  %1510 = vmatprep.subr.msk.bf16.mxu0 %vm1724_vm2, %v1508_v9 }
  0x19   : > { %1490 = vmatmul.mubr.msk.f32.vlgmr.msra.gmra.mrb[2].mxu1 %vm249_vm0, %v253_v2 }
  0x1a   : > { %1494 = vmatprep.mubr.msk.f32.mxu1 %vm1632_vm1, %v1631_v1 }
  0x1d   : > { %1513 = vmatpush3.bf16.xpose.msk.msra.mxu0 %vm1724_vm2, %v1508_v9 }
  0x1e   : > { %1516 = vmatprep.subr.msk.bf16.mxu0 %vm1724_vm2, %v1514_v12 }
  0x25   : > { %1519 = vmatpush3.bf16.xpose.msk.msra.mxu0 %vm1724_vm2, %v1514_v12 }
  0x26   : > { %1522 = vmatprep.subr.msk.bf16.mxu0 %vm1724_vm2, %v1520_v15 }
  0x2d   : > { %1525 = vmatpush3.bf16.xpose.msk.msra.mxu0 %vm1724_vm2, %v1520_v15 }
  0x34   : > { %1480 = vmatmul.mubr.msk.f32.vlgmr.msra.gmra.mrb[0].mxu0 %vm249_vm0, %v253_v2 }
  0xe8   : > { %v441_v24 = vpop.f32.mrb[0].mxu1 }
  0xe9   : > { %v1486_v25 = vpop.f32.mrb[1].mxu1  ;;  %v532_v26 = vrot.slane %v441_v24, %v531_v22  ;;  %v518_v27 = vrot.slane %v441_v24, %v1766_v21  ;;  %v636_v31 = vrot.slane %v441_v24, %v1770_v23  ;;  %v629_v32 = vcombine.high %v441_v24, %v441_v24 }
  0xea   : > { %v539_v36 = vrot.slane %v441_v24, %v538_v28  ;;  %v525_v37 = vrot.slane %v441_v24, %v524_v29  ;;  %v553_v39 = vrot.slane %v441_v24, %v552_v30  ;;  %v546_v43 = vrot.slane %v441_v24, %v545_v33 }
  0xeb   : > { %534 = vbcast.lane.b32.xlu1 %v532_v26, 256  ;;  %520 = vbcast.lane.b32.xlu0 %v518_v27, 256  ;;  %v1788_v40 = vrot.slane %v636_v31, %v1770_v23  ;;  %v644_v41 = vcombine.high %v636_v31, %v636_v31  ;;  %v643_v42 = vrot.slane %v629_v32, %v1770_v23 }
  0xec   : > { %v1780_v34 = vpop.f32.mrb[2].mxu1  ;;  %v560_v44 = vrot.slane %v441_v24, %v559_v35  ;;  %v567_v13 = vrot.slane %v441_v24, %v566_v55 }
  0xed   : > { %v1491_v38 = vpop.f32.mrb[3].mxu1  ;;  %v685_v45 = vrot.slane %v1780_v34, %v1770_v23  ;;  %v678_v46 = vcombine.high %v1780_v34, %v1780_v34  ;;  %v674_v47 = vcombine.high %v1788_v40, %v1788_v40  ;;  %v730_v48 = vrot.slane %v1788_v40, %v1766_v21 }
  0xee   : > { %v1804_v49 = vrot.slane %v644_v41, %v1770_v23  ;;  %v645_v50 = vcombine.high %v643_v42, %v643_v42  ;;  %v581_v51 = vrot.slane %v1780_v34, %v524_v29  ;;  %v1808_v52 = vrot.slane %v643_v42, %v1770_v23 }
  0xef   : > { %541 = vbcast.lane.b32.xlu1 %v539_v36, 256  ;;  %527 = vbcast.lane.b32.xlu0 %v525_v37, 256  ;;  %v693_v53 = vcombine.high %v685_v45, %v685_v45  ;;  %v1811_v54 = vrot.slane %v685_v45, %v1770_v23  ;;  %v738_v56 = vrot.slane %v674_v47, %v1766_v21 }
  0xf0   : > { %v676_v57 = vcombine.high %v1804_v49, %v1804_v49  ;;  %v734_v58 = vrot.slane %v1804_v49, %v1766_v21  ;;  %v1820_v59 = vrot.slane %v645_v50, %v1770_v23  ;;  %v746_v60 = vrot.slane %v1808_v52, %v1766_v21 }
  0xf1   : > { %v675_v61 = vcombine.high %v1808_v52, %v1808_v52  ;;  %v1827_v62 = vrot.slane %v693_v53, %v1770_v23  ;;  %v723_v0 = vcombine.high %v1811_v54, %v1811_v54  ;;  %v762_v2 = vrot.slane %v1811_v54, %v1766_v21 }
  0xf2   : > { %v742_v63 = vrot.slane %v676_v57, %v1766_v21  ;;  %v692_v3 = vrot.slane %v678_v46, %v1770_v23  ;;  %v750_v4 = vrot.slane %v1820_v59, %v1766_v21  ;;  %v677_v7 = vcombine.high %v1820_v59, %v1820_v59 }
  0xf3   : > { %555 = vbcast.lane.b32.xlu1 %v553_v39, 256  ;;  %548 = vbcast.lane.b32.xlu0 %v546_v43, 256  ;;  %v1838_v5 = vrot.slane %v675_v61, %v1766_v21  ;;  %v766_v6 = vrot.slane %v1827_v62, %v1766_v21  ;;  %v1845_v8 = vrot.slane %v723_v0, %v1766_v21 }
  0xf4   : > { %v725_v9 = vcombine.high %v1827_v62, %v1827_v62  ;;  %v694_v10 = vcombine.high %v692_v3, %v692_v3  ;;  %v1850_v11 = vrot.slane %v677_v7, %v1766_v21  ;;  %v1853_v12 = vrot.slane %v692_v3, %v1770_v23 }
  0xf5   : > { %v588_v14 = vrot.slane %v1780_v34, %v531_v22  ;;  %v574_v25 = vrot.slane %v1780_v34, %v1766_v21  ;;  %v609_v27 = vrot.slane %v1780_v34, %v552_v30  ;;  %v602_v29 = vrot.slane %v1780_v34, %v545_v33 }
  0xf6   : > { %v1859_v15 = vrot.slane %v725_v9, %v1766_v21  ;;  %v1862_v16 = vrot.slane %v694_v10, %v1770_v23  ;;  %v778_v17 = vrot.slane %v1853_v12, %v1766_v21  ;;  %v724_v18 = vcombine.high %v1853_v12, %v1853_v12 }
  0xf7   : > { %562 = vbcast.lane.b32.xlu0 %v560_v44, 256  ;;  %583 = vbcast.lane.b32.xlu1 %v581_v51, 256  ;;  %v595_v23 = vrot.slane %v1780_v34, %v538_v28  ;;  %v623_v28 = vrot.slane %v1780_v34, %v566_v55  ;;  %v616_v31 = vrot.slane %v1780_v34, %v559_v35 }
  0xf8   : > { %v782_v20 = vrot.slane %v1862_v16, %v1766_v21  ;;  %v726_v22 = vcombine.high %v1862_v16, %v1862_v16  ;;  %v1873_v24 = vrot.slane %v724_v18, %v1766_v21 }
  0xfa   : > { %v1881_v26 = vrot.slane %v726_v22, %v1766_v21 }
  0xfb   : > { %569 = vbcast.lane.b32.xlu0 %v567_v13, 256  ;;  %590 = vbcast.lane.b32.xlu1 %v588_v14, 256 }
  0xff   : > { %597 = vbcast.lane.b32.xlu1 %v595_v23, 256  ;;  %576 = vbcast.lane.b32.xlu0 %v574_v25, 256 }
 0x103   : > { %611 = vbcast.lane.b32.xlu1 %v609_v27, 256  ;;  %604 = vbcast.lane.b32.xlu0 %v602_v29, 256 }
 0x107   : > { %625 = vbcast.lane.b32.xlu1 %v623_v28, 256  ;;  %618 = vbcast.lane.b32.xlu0 %v616_v31, 256 }
 0x15d   : > { %v535_v32 = vpop.permute.xlu1 %534  ;;  %v521_v36 = vpop.permute.xlu0 %520 }
 0x15e   : > { %vm809_vm4 = vcmp.gt.f32.partialorder %v535_v32, %v738_v56  ;;  %vm807_vm5 = vcmp.gt.f32.partialorder %v521_v36, %v730_v48 }
 0x15f   : > { %v1408_v30 = vsel %vm809_vm4, 1.0, %v1631_v1  ;;  %v1406_v37 = vsel %vm807_vm5, 1.0, %v1631_v1 }
 0x160   : > { %v870_v33 = vsel %vm855_vm3, %v1408_v30, 0.0  ;;  %v856_v38 = vsel %vm855_vm3, %v1406_v37, 0.0 }
 0x161   : > { %v871_v39 = vrot.slane %v870_v33, 4  ;;  %v857_v40 = vrot.slane %v856_v38, 4  ;;  %v542_v19 = vpop.permute.xlu1 %541  ;;  %v528_v41 = vpop.permute.xlu0 %527 }
 0x162   : > { %vm810_vm6 = vcmp.gt.f32.partialorder %v542_v19, %v742_v63  ;;  %vm808_vm7 = vcmp.gt.f32.partialorder %v528_v41, %v734_v58 }
 0x163   : > { %v872_v34 = vadd.f32 %v871_v39, %v870_v33  ;;  %v858_v35 = vadd.f32 %v857_v40, %v856_v38  ;;  %v1409_v42 = vsel %vm810_vm6, 1.0, %v1631_v1  ;;  %v1407_v43 = vsel %vm808_vm7, 1.0, %v1631_v1 }
 0x164   : > { %v877_v44 = vsel %vm855_vm3, %v1409_v42, 0.0  ;;  %v863_v45 = vsel %vm855_vm3, %v1407_v43, 0.0 }
 0x165   : > { %v873_v46 = vrot.slane %v872_v34, 2  ;;  %v859_v47 = vrot.slane %v858_v35, 2  ;;  %v878_v48 = vrot.slane %v877_v44, 4  ;;  %v864_v49 = vrot.slane %v863_v45, 4  ;;  %v556_v50 = vpop.permute.xlu1 %555  ;;  %v549_v51 = vpop.permute.xlu0 %548 }
 0x166   : > { %vm812_vm8 = vcmp.gt.f32.partialorder %v556_v50, %v750_v4  ;;  %vm811_vm9 = vcmp.gt.f32.partialorder %v549_v51, %v746_v60 }
 0x167   : > { %v874_v53 = vadd.f32 %v873_v46, %v872_v34  ;;  %v860_v55 = vadd.f32 %v859_v47, %v858_v35  ;;  %v879_v56 = vadd.f32 %v878_v48, %v877_v44  ;;  %v865_v57 = vadd.f32 %v864_v49, %v863_v45 }
 0x168   : > { %v1411_v58 = vsel %vm812_vm8, 1.0, %v1631_v1  ;;  %v1410_v59 = vsel %vm811_vm9, 1.0, %v1631_v1 }
 0x169   : > { %v875_v61 = vrot.slane %v874_v53, 1  ;;  %v861_v63 = vrot.slane %v860_v55, 1  ;;  %v880_v0 = vrot.slane %v879_v56, 2  ;;  %v866_v3 = vrot.slane %v865_v57, 2  ;;  %v563_v7 = vpop.permute.xlu0 %562  ;;  %v584_v9 = vpop.permute.xlu1 %583 }
 0x16a   : > { %v891_v4 = vsel %vm855_vm3, %v1411_v58, 0.0  ;;  %v884_v10 = vsel %vm855_vm3, %v1410_v59, 0.0  ;;  %vm813_vm10 = vcmp.gt.f32.partialorder %v563_v7, %v1838_v5  ;;  %vm816_vm11 = vcmp.gt.f32.partialorder %v584_v9, %v766_v6 }
 0x16b   : > { %v876_v52 = vadd.f32 %v875_v61, %v874_v53  ;;  %v862_v60 = vadd.f32 %v861_v63, %v860_v55  ;;  %v881_v13 = vadd.f32 %v880_v0, %v879_v56  ;;  %v867_v14 = vadd.f32 %v866_v3, %v865_v57 }
 0x16c   : > { %v892_v18 = vrot.slane %v891_v4, 4  ;;  %v885_v22 = vrot.slane %v884_v10, 4  ;;  %v1412_v23 = vsel %vm813_vm10, 1.0, %v1631_v1  ;;  %v1415_v25 = vsel %vm816_vm11, 1.0, %v1631_v1 }
 0x16d   : > { %vm970_vm12 = vcmp.lt.f32.partialorder %v876_v52, 4.0  ;;  %v882_v27 = vrot.slane %v881_v13, 1  ;;  %v868_v29 = vrot.slane %v867_v14, 1  ;;  %v570_v28 = vpop.permute.xlu0 %569  ;;  %v591_v5 = vpop.permute.xlu1 %590  ;;  %vm968_vm14 = vcmp.lt.f32.partialorder %v862_v60, 4.0 }
 0x16e   : > { %v1915_v31 = vsel %vm970_vm12, 1.0, %v1631_v1  ;;  %v893_v62 = vadd.f32 %v892_v18, %v891_v4  ;;  %v886_v6 = vadd.f32 %v885_v22, %v884_v10  ;;  %v898_v30 = vsel %vm855_vm3, %v1412_v23, 0.0 }
 0x16f   : > { %v883_v32 = vadd.f32 %v882_v27, %v881_v13  ;;  %v869_v36 = vadd.f32 %v868_v29, %v867_v14  ;;  %v919_v37 = vsel %vm855_vm3, %v1415_v25, 0.0  ;;  %v899_v39 = vrot.slane %v898_v30, 4 }
 0x170   : > { %v894_v33 = vrot.slane %v893_v62, 2  ;;  %v887_v38 = vrot.slane %v886_v6, 2  ;;  %v920_v40 = vrot.slane %v919_v37, 4  ;;  %v1422_v19 = vsel %vm968_vm14, 1.0, %v1631_v1 }
 0x171   : > { %vm969_vm15 = vcmp.lt.f32.partialorder %v869_v36, 4.0  ;;  %vm814_vm2 = vcmp.gt.f32.partialorder %v570_v28, %v1850_v11  ;;  %vm817_vm4 = vcmp.gt.f32.partialorder %v591_v5, %v1845_v8  ;;  %v598_v41 = vpop.permute.xlu1 %597  ;;  %vm971_vm5 = vcmp.lt.f32.partialorder %v883_v32, 4.0  ;;  %v577_v43 = vpop.permute.xlu0 %576 }
 0x172   : > { %v1423_v34 = vsel %vm969_vm15, 1.0, %v1631_v1  ;;  %v895_v35 = vadd.f32 %v894_v33, %v893_v62  ;;  %v888_v42 = vadd.f32 %v887_v38, %v886_v6  ;;  %v900_v45 = vadd.f32 %v899_v39, %v898_v30 }
 0x173   : > { %v1924_v44 = vsel %vm1032_vm13, %v1423_v34, %v1422_v19  ;;  %v921_v46 = vadd.f32 %v920_v40, %v919_v37  ;;  %v1413_v47 = vsel %vm814_vm2, 1.0, %v1631_v1  ;;  %v1416_v8 = vsel %vm817_vm4, 1.0, %v1631_v1 }
 0x174   : > { %v896_v48 = vrot.slane %v895_v35, 1  ;;  %v889_v49 = vrot.slane %v888_v42, 1  ;;  %v905_v11 = vsel %vm855_vm3, %v1413_v47, 0.0  ;;  %v901_v50 = vrot.slane %v900_v45, 2 }
 0x175   : > { %v922_v51 = vrot.slane %v921_v46, 2  ;;  %v906_v53 = vrot.slane %v905_v11, 4  ;;  %v926_v55 = vsel %vm855_vm3, %v1416_v8, 0.0  ;;  %v1932_v56 = vsel %vm971_vm5, 1.0, %v1631_v1  ;;  %v612_v59 = vpop.permute.xlu1 %611  ;;  %v605_v10 = vpop.permute.xlu0 %604 }
 0x176   : > { %v890_v57 = vadd.f32 %v889_v49, %v888_v42  ;;  %v927_v58 = vrot.slane %v926_v55, 4  ;;  %vm818_vm6 = vcmp.gt.f32.partialorder %v598_v41, %v1859_v15  ;;  %v1935_v61 = vadd.f32 %v901_v50, %v900_v45 }
 0x177   : > { %v923_v63 = vadd.f32 %v922_v51, %v921_v46  ;;  %v907_v0 = vadd.f32 %v906_v53, %v905_v11  ;;  %v1417_v3 = vsel %vm818_vm6, 1.0, %v1631_v1  ;;  %v1938_v7 = vadd.f32 %v896_v48, %v895_v35 }
 0x178   : > { %vm972_vm7 = vcmp.lt.f32.partialorder %v890_v57, 4.0  ;;  %v928_v9 = vadd.f32 %v927_v58, %v926_v55  ;;  %v933_v4 = vsel %vm855_vm3, %v1417_v3, 0.0  ;;  %v903_v60 = vrot.slane %v1935_v61, 1 }
 0x179   : > { %v1942_v52 = vsel %vm972_vm7, 1.0, %v1631_v1  ;;  %v924_v15 = vrot.slane %v923_v63, 1  ;;  %v908_v13 = vrot.slane %v907_v0, 2  ;;  %v934_v18 = vrot.slane %v933_v4, 4  ;;  %v626_v6 = vpop.permute.xlu1 %625  ;;  %v619_v30 = vpop.permute.xlu0 %618 }
 0x17a   : > { %v929_v14 = vrot.slane %v928_v9, 2  ;;  %vm815_vm8 = vcmp.gt.f32.partialorder %v577_v43, %v762_v2  ;;  %vm820_vm9 = vcmp.gt.f32.partialorder %v612_v59, %v782_v20  ;;  %vm819_vm11 = vcmp.gt.f32.partialorder %v605_v10, %v778_v17 }
 0x17b   : > { %v925_v22 = vadd.f32 %v924_v15, %v923_v63  ;;  %v909_v23 = vadd.f32 %v908_v13, %v907_v0  ;;  %v1414_v25 = vsel %vm815_vm8, 1.0, %v1631_v1  ;;  %v1419_v27 = vsel %vm820_vm9, 1.0, %v1631_v1 }
 0x17c   : > { %v930_v29 = vadd.f32 %v929_v14, %v928_v9  ;;  %v935_v28 = vadd.f32 %v934_v18, %v933_v4  ;;  %v912_v5 = vsel %vm855_vm3, %v1414_v25, 0.0  ;;  %v947_v62 = vsel %vm855_vm3, %v1419_v27, 0.0 }
 0x17d   : > { %vm977_vm10 = vcmp.lt.f32.partialorder %v925_v22, 4.0  ;;  %v913_v54 = vrot.slane %v912_v5, 4  ;;  %v948_v2 = vrot.slane %v947_v62, 4  ;;  %vm973_vm12 = vcmp.lt.f32.partialorder %v1938_v7, 4.0 }
 0x17e   : > { %v1431_v16 = vsel %vm977_vm10, 1.0, %v1631_v1  ;;  %v931_v20 = vrot.slane %v930_v29, 1  ;;  %v936_v32 = vrot.slane %v935_v28, 2  ;;  %v1418_v36 = vsel %vm819_vm11, 1.0, %v1631_v1 }
 0x17f   : > { %v914_v37 = vadd.f32 %v913_v54, %v912_v5  ;;  %v949_v33 = vadd.f32 %v948_v2, %v947_v62  ;;  %v940_v38 = vsel %vm855_vm3, %v1418_v36, 0.0  ;;  %vm822_vm14 = vcmp.gt.f32.partialorder %v626_v6, %v1881_v26 }
 0x180   : > { %v932_v39 = vadd.f32 %v931_v20, %v930_v29  ;;  %v937_v40 = vadd.f32 %v936_v32, %v935_v28  ;;  %v941_v19 = vrot.slane %v940_v38, 4  ;;  %v1421_v21 = vsel %vm822_vm14, 1.0, %v1631_v1 }
 0x181   : > { %vm1034_vm15 = vcmask 1042434   ;;  %v915_v12 = vrot.slane %v914_v37, 2  ;;  %v950_v17 = vrot.slane %v949_v33, 2  ;;  %v961_v41 = vsel %vm855_vm3, %v1421_v21, 0.0  ;;  %v1391_v21 = vld [vmem:[%s2071_s2] ss:$0 sm:$0xff] }
 0x182   : > { %vm821_vm2 = vcmp.gt.f32.partialorder %v619_v30, %v1873_v24  ;;  %vm1036_vm4 = vcmask 1043459   ;;  %vm978_vm5 = vcmp.lt.f32.partialorder %v932_v39, 4.0  ;;  %v938_v34 = vrot.slane %v937_v40, 1 }
 0x183   : > { %v942_v35 = vadd.f32 %v941_v19, %v940_v38  ;;  %v962_v42 = vrot.slane %v961_v41, 4  ;;  %vm1038_vm6 = vcmask 1044484   ;;  %v1432_v26 = vsel %vm978_vm5, 1.0, %v1631_v1  ;;  %v1481_v38 = vpop.f32.mrb[0].mxu0 }
 0x184   : > { %v916_v43 = vadd.f32 %v915_v12, %v914_v37  ;;  %v951_v45 = vadd.f32 %v950_v17, %v949_v33  ;;  %v1420_v46 = vsel %vm821_vm2, 1.0, %v1631_v1  ;;  %vm1040_vm7 = vcmask 1045509   ;;  %v366_v39 = vpop.f32.mrb[1].mxu0 }
 0x185   : > { %v939_v47 = vadd.f32 %v938_v34, %v937_v40  ;;  %v943_v48 = vrot.slane %v942_v35, 2  ;;  %v963_v49 = vadd.f32 %v962_v42, %v961_v41  ;;  %v954_v11 = vsel %vm855_vm3, %v1420_v46, 0.0 }
 0x186   : > { %vm1042_vm8 = vcmask 1046534   ;;  %v917_v24 = vrot.slane %v916_v43, 1  ;;  %v952_v8 = vrot.slane %v951_v45, 1  ;;  %v955_v50 = vrot.slane %v954_v11, 4 }
 0x187   : > { %v904_v51 = vadd.f32 %v903_v60, %v1935_v61  ;;  %vm1044_vm9 = vcmask 1047559   ;;  %vm979_vm10 = vcmp.lt.f32.partialorder %v939_v47, 4.0  ;;  %v944_v53 = vadd.f32 %v943_v48, %v942_v35 }
 0x188   : > { %v964_v55 = vrot.slane %v963_v49, 2  ;;  %v910_v57 = vrot.slane %v909_v23, 1  ;;  %v1433_v58 = vsel %vm979_vm10, 1.0, %v1631_v1  ;;  %v918_v59 = vadd.f32 %v917_v24, %v916_v43 }
 0x189   : > { %v953_v63 = vadd.f32 %v952_v8, %v951_v45  ;;  %v956_v0 = vadd.f32 %v955_v50, %v954_v11  ;;  %v945_v3 = vrot.slane %v944_v53, 1  ;;  %vm974_vm11 = vcmp.lt.f32.partialorder %v904_v51, 4.0 }
 0x18a   : > { %v965_v9 = vadd.f32 %v964_v55, %v963_v49  ;;  %v911_v4 = vadd.f32 %v910_v57, %v909_v23  ;;  %vm976_vm14 = vcmp.lt.f32.partialorder %v918_v59, 4.0  ;;  %v1427_v61 = vsel %vm973_vm12, 1.0, %v1631_v1  ;;  %v1232_v59 = vld [vmem:[#allocation4] sm:$0xff] }
 0x18b   : > { %vm981_vm2 = vcmp.lt.f32.partialorder %v953_v63, 4.0  ;;  %v957_v10 = vrot.slane %v956_v0, 2  ;;  %v1430_v60 = vsel %vm976_vm14, 1.0, %v1631_v1  ;;  %v946_v15 = vadd.f32 %v945_v3, %v944_v53 }
 0x18c   : > { %vm975_vm5 = vcmp.lt.f32.partialorder %v911_v4, 4.0  ;;  %v1428_v13 = vsel %vm974_vm11, 1.0, %v1631_v1  ;;  %v1046_v14 = vsel %vm1032_vm13, %v1431_v16, %v1430_v60  ;;  %v1035_v23 = vsel %vm1034_vm15, %v1915_v31, %v1924_v44 }
 0x18d   : > { %v958_v18 = vadd.f32 %v957_v10, %v956_v0  ;;  %v1429_v22 = vsel %vm975_vm5, 1.0, %v1631_v1  ;;  %vm980_vm10 = vcmp.lt.f32.partialorder %v946_v15, 4.0  ;;  %v1037_v7 = vsel %vm1036_vm4, %v1932_v56, %v1035_v23 }
 0x18e   : > { %v966_v25 = vrot.slane %v965_v9, 1  ;;  %v1435_v27 = vsel %vm981_vm2, 1.0, %v1631_v1  ;;  %v1434_v29 = vsel %vm980_vm10, 1.0, %v1631_v1  ;;  %v1039_v5 = vsel %vm1038_vm6, %v1942_v52, %v1037_v7 }
 0x18f   : > { %v959_v28 = vrot.slane %v958_v18, 1  ;;  %v1047_v62 = vsel %vm1034_vm15, %v1432_v26, %v1046_v14  ;;  %v1041_v6 = vsel %vm1040_vm7, %v1427_v61, %v1039_v5  ;;  %v367_v12 = vadd.f32 %v1391_v21, %v366_v39 }
 0x190   : > { %v967_v54 = vadd.f32 %v966_v25, %v965_v9  ;;  %v1048_v31 = vsel %vm1036_vm4, %v1433_v58, %v1047_v62  ;;  %v1043_v44 = vsel %vm1042_vm8, %v1428_v13, %v1041_v6  ;;  %v372_v34 = vadd.f32 %v1481_v38, %v1391_v21 }
 0x191   : > { %v960_v2 = vadd.f32 %v959_v28, %v958_v18  ;;  %v1049_v56 = vsel %vm1038_vm6, %v1434_v29, %v1048_v31  ;;  %v1045_v16 = vsel %vm1044_vm9, %v1429_v22, %v1043_v44 }
 0x192   : > { %vm983_vm13 = vcmp.lt.f32.partialorder %v967_v54, 4.0  ;;  %v1050_v20 = vsel %vm1040_vm7, %v1435_v27, %v1049_v56  ;;  %v1055_v32 = vsel %vm855_vm3, %v1045_v16, 0.0 }
 0x193   : > { %vm982_vm12 = vcmp.lt.f32.partialorder %v960_v2, 4.0  ;;  %v1437_v52 = vsel %vm983_vm13, 1.0, %v1631_v1  ;;  %1056 = vadd.xlane.f32.xlu0 %v1055_v32 }
 0x194   : > { %v1436_v36 = vsel %vm982_vm12, 1.0, %v1631_v1 }
 0x195   : > { %v1051_v30 = vsel %vm1042_vm8, %v1436_v36, %v1050_v20 }
 0x196   : > { %v1052_v37 = vsel %vm1044_vm9, %v1437_v52, %v1051_v30 }
 0x197   : > { %v1058_v33 = vsel %vm855_vm3, %v1052_v37, 0.0 }
 0x198   : > { %1059 = vadd.xlane.f32.xlu1 %v1058_v33 }
 0x220   : > { %v1057_v40 = vpop.xlane.xlu0 %1056 }
 0x221   : > { %1569 = vrsqrt.f32 %v1057_v40 }
 0x225   : > { %v1060_v19 = vpop.xlane.xlu1 %1059 }
 0x226   : > { %1571 = vrsqrt.f32 %v1060_v19 }
 0x22b   : > { %v1570_v17 = vpop.eup %1569 }
 0x22c   : > { %v1063_v41 = vmul.f32 %v1570_v17, %v367_v12 }
 0x22e   : > { %1066 = vrot.lane.b32.xlu0 %v1063_v41, %s1634_s27 }
 0x230   : > { %v1572_v35 = vpop.eup %1571 }
 0x231   : > { %v1064_v42 = vmul.f32 %v1572_v35, %v372_v34 }
 0x233   : > { %1142 = vrot.lane.b32.xlu1 %v1064_v42, %s1634_s27 }
 0x2a0   : > { %v1067_v26 = vpop.permute.xlu0 %1066 }
 0x2a1   : > { %1493 = vmatpush3.msra.mxu1 %v1067_v26 }
 0x2a2   : > { %1495 = vmatmul.mubr.msk.f32.vlgmr.msra.gmra.mrb[4].mxu1 %vm855_vm3, %v1045_v16  ;;  %1497 = vmatprep.subr.mxu1 %v1631_v1 }
 0x2a3   : > { %1499 = vmatprep.mubr.msk.f32.mxu1 %vm1632_vm1, %v1631_v1  ;;  %v1226_v1 = vld [vmem:[#allocation3] sm:$0xff] }
 0x2a5   : > { %v1143_v43 = vpop.permute.xlu1 %1142 }
 0x2a6   : > { %1498 = vmatpush3.msra.mxu1 %v1143_v43 }
 0x2a7   : > { %1500 = vmatmul.mubr.msk.f32.vlgmr.msra.gmra.mrb[6].mxu1 %vm855_vm3, %v1052_v37 }
 0x375   : > { %v1137_v45 = vpop.f32.mrb[4].mxu1 }
 0x376   : > { %v1217_v46 = vmul.f32 %v1570_v17, %v1137_v45  ;;  %v1496_v47 = vpop.f32.mrb[5].mxu1 }
 0x378   : > { %v1219_v48 = vadd.f32 %v1217_v46, %v367_v12 }
 0x37a   : > { %v1213_v49 = vpop.f32.mrb[6].mxu1  ;;  %1224 = vst.msk [vmem:[#allocation2] sm:$0xff] %vm249_vm0, %v1219_v48  ;;  %v1233_v8 = vmul.f32 %v1219_v48, %v1219_v48  ;;  %v1227_v51 = vsel %vm249_vm0, %v1219_v48, 0.0 }
 0x37b   : > { %v1218_v11 = vmul.f32 %v1572_v35, %v1213_v49  ;;  %v1501_v24 = vpop.f32.mrb[7].mxu1 }
 0x37c   : > { %v1235_v58 = vsel %vm249_vm0, %v1233_v8, 0.0 }
 0x37d   : > { %v1220_v50 = vadd.f32 %v1218_v11, %v372_v34 }
 0x37f   : > { %1225 = vst.msk [vmem:[#allocation2 + $0x8] sm:$0xff] %vm249_vm0, %v1220_v50  ;;  %v1228_v53 = vsel %vm249_vm0, %v1220_v50, 0.0  ;;  %v1234_v55 = vmul.f32 %v1220_v50, %v1220_v50 }
 0x380   : > { %v1229_v57 = vadd.f32 %v1228_v53, %v1227_v51 }
 0x381   : > { %v1236_v63 = vsel %vm249_vm0, %v1234_v55, 0.0 }
 0x382   : > { %v1230_v0 = vadd.f32 %v1229_v57, %v1226_v1  ;;  %v1237_v3 = vadd.f32 %v1236_v63, %v1235_v58 }
 0x384   : > { %1231 = vst.msk [vmem:[#allocation3] sm:$0xff] %vm249_vm0, %v1230_v0  ;;  %v1238_v9 = vadd.f32 %v1237_v3, %v1232_v59 }
 0x386   : > { %1239 = vst.msk [vmem:[#allocation4] sm:$0xff] %vm249_vm0, %v1238_v9 }
 0x387 PF: > { %p1440_p5 = scmp.ne.s32.totalorder %s1621_s18, 1 }
 0x388   : > { %vm1245_vm1 = vcmask (!%p1440_p5), 261120   ;;  %v1635_v15 = vmov (!%p1440_p5), 0   ;;  %v1260_v27 = vld [vmem:[%s2072_s3] sm:$0xff] (!%p1440_p5)  ;;  %v1270_v44 = vld [vmem:[#allocation2 + $0x8] sm:$0xff] (!%p1440_p5) }
 0x389   : > { %1243 = sbr.rel (%p1440_p5) target bundleno = 1211 (0x4bb), region = 52  ;;  %1573 = vset.pattern.permute.xlu1 (!%p1440_p5), %v1635_v15  ;;  %1574 = vset.pattern.permute.xlu0 (!%p1440_p5), %v1635_v15  ;;  %v1262_v6 = vld [vmem:[%s2073_s4] sm:$0xff] (!%p1440_p5)  ;;  %v1272_v16 = vld [vmem:[%s2069_s0 + $0x8] sm:$0xff] (!%p1440_p5) }
 0x38a   : > { %v1269_v31 = vld [vmem:[#allocation2] sm:$0xff] (!%p1440_p5) }
 0x38b   : > { %v1244_v4 = vld [vmem:[#allocation3] sm:$0xff] (!%p1440_p5)  ;;  %v1271_v56 = vld [vmem:[%s2069_s0] sm:$0xff] (!%p1440_p5) }
 0x38c   : > { %v1246_v61 = vsel (!%p1440_p5), %vm1245_vm1, %v1244_v4, 0.0 }
 0x38d   : > { %v1249_v10 = vld [vmem:[#allocation4] sm:$0xff] (!%p1440_p5)  ;;  %1247 = vadd.xlane.f32.xlu0 (!%p1440_p5), %v1246_v61 }
 0x38e   : > { %v1250_v60 = vsel (!%p1440_p5), %vm1245_vm1, %v1249_v10, 0.0 }
 0x391   : > { %1251 = vadd.xlane.f32.xlu0 %v1250_v60 }
 0x41a   : > { %v1248_v13 = vpop.xlane.xlu0 %1247 }
 0x41b   : > { %v1254_v14 = vmul.f32 0.015625, %v1248_v13 }
 0x41d   : > { %v1256_v22 = vmul.f32 %v1254_v14, %v1254_v14  ;;  %v1263_v29 = vmul.f32 %v1260_v27, %v1254_v14 }
 0x41e   : > { %v1252_v18 = vpop.xlane.xlu0 %1251 }
 0x41f   : > { %v1255_v23 = vmul.f32 0.015625, %v1252_v18 }
 0x421   : > { %v1257_v7 = vsub.f32 %v1255_v23, %v1256_v22 }
 0x423   : > { %v1258_v25 = vadd.f32 1e-05, %v1257_v7 }
 0x425   : > { %1575 = vrsqrt.f32 %v1258_v25 }
 0x42f   : > { %v1576_v28 = vpop.eup %1575 }
 0x430   : > { %v1261_v5 = vmul.f32 %v1576_v28, %v1260_v27  ;;  %v1264_v62 = vmul.f32 %v1576_v28, %v1263_v29 }
 0x432   : > { %1275 = vperm.xlu1 %1573, %v1261_v5   ;;  %v1265_v54 = vsub.f32 %v1262_v6, %v1264_v62 }
 0x436   : > { %1284 = vperm.xlu1 %1573, %v1265_v54  }
 0x4b1   : > { %v1276_v2 = vpop.permute.xlu1 %1275 }
 0x4b2   : > { %v1278_v20 = vmul.f32 %v1276_v2, %v1269_v31  ;;  %v1279_v32 = vmul.f32 %v1276_v2, %v1270_v44 }
 0x4b4   : > { %v1280_v52 = vadd.f32 %v1278_v20, %v1271_v56  ;;  %v1281_v36 = vadd.f32 %v1279_v32, %v1272_v16 }
 0x4b5   : > { %v1285_v30 = vpop.permute.xlu1 %1284 }
 0x4b6   : > { %v1287_v37 = vadd.f32 %v1285_v30, %v1280_v52  ;;  %v1288_v33 = vadd.f32 %v1285_v30, %v1281_v36 }
 0x4b8   : > { %v1289_v38 = vmax.f32 %v1287_v37, 0.0  ;;  %v1290_v39 = vmax.f32 %v1288_v33, 0.0 }
 0x4ba   : > { %1291 = vst.msk [vmem:[#allocation5] sm:$0xff] %vm1245_vm1, %v1289_v38  ;;  %1292 = vst.msk [vmem:[#allocation5 + $0x8] sm:$0xff] %vm1245_vm1, %v1290_v39 }
 0x4bb PF: > { %p2035_p6 = scmp.eq.s32.totalorder %s1385_s21, 1  ;;  %s1636_s11 = smov [#allocation5]  }
 0x4bc   : > { %s1308_s12 = sshll.u32 %s1636_s11, 4  ;;  %s1309_s12 = int_to_ptr.vmem [resolvable:$true] %s1308_s12 }
 0x4bd   : > { %s1577_s13 = scalar_lea.vmem %s1309_s12, 256  ;;  %s1583_s14 = scalar_lea.vmem %s1309_s12, 512 }
 0x4be   : > { %p1578_p7 = scmp.ne.s32.totalorder %s1309_s12, %s1577_s13  ;;  %p1584_p10 = scmp.lt.s32.totalorder %s1309_s12, %s1309_s12 }
 0x4bf   : > { %p1585_p11 = scmp.lt.s32.totalorder %s1583_s14, %s1577_s13 }
 0x4c0   : > { %p1579_p8 = pnand %p1578_p7, %p2035_p6 }
 0x4c1   : > { %p1586_p12 = por %p1585_p11, %p1584_p10 }
 0x4c2   : > { %p1580_p9 = pneg %p1579_p8 }
 0x4c4   : > { %p1587_p13 = pnand %p1586_p12, %p1580_p9 }
 0x4c6   : > { %1590 = shalt.err (!%p1587_p13)
}
 0x4c7   : > { %s1591_s16 = scalar_lea.hbm %s2074_s5, 256 }
 0x4c8   : > { %p1592_p0 = scmp.ne.s32.totalorder %s2074_s5, %s1591_s16  ;;  %p1597_p3 = scmp.lt.u32.totalorder %s1591_s16, %s2074_s5 }
 0x4ca   : > { %p1593_p1 = pnand %p1592_p0, %p2035_p6 }
 0x4cc   : > { %p1594_p2 = pneg %p1593_p1 }
 0x4ce   : > { %p1599_p4 = pnand %p1597_p3, %p1594_p2 }
 0x4d0   : > { %1602 = shalt.err (!%p1599_p4)
}
 0x4d1   : > { %s1637_s27 = smov 128   ;;  %s1638_s18 = smov 8  }
 0x4d2   : > { %1527 = dma.vmem_to_hbm [thread:$0]  (%p2035_p6), %s1309_s12, 256, %s2074_s5, [#allocation6], %s1637_s27, %s1637_s27, %s1638_s18  }
 0x4d3 PF: > { %p1535_p5 = scmp.ge.s32.totalorder %s1629_s20, 2  ;;  %p1536_p7 = scmp.eq.s32.totalorder %s1386_s22, 1 }
 0x4d5   : > { %p1531_p8 = pnand %p1536_p7, %p1535_p5 }
 0x4d7   : > { %1616 = dma.done.wait (!%p1531_p8), [#allocation6], 256  }
 0x4d8   : > { %1618 = vsyncadd (!%p1531_p8), [#allocation6], 4294967040  ;;  %s18_s20 = sadd.s32 1, %s1629_s20   ;;  %s2078_s18 = smov %s1625_s19 }
 0x4d9   : > { %p15_p9 = scmp.ge.s32.totalorder %s18_s20, 4   ;;  %s2079_s19 = smov %s2081_s23 }
 0x4db   :  { %17 = sbr.rel (!%p15_p9) target bundleno = 3 (0x3), region = 89 }
 0x4e2   :  { %1329 = vsyncpa [#allocation6], 1 }
 0x4e3   :  { %1331 = vsyncpa [#allocation6 + $0x1], 1 }

</bundles_post_ra>
